<compile_context>
chip_gen: v7x
topology: tpu7x:2x2x1
jax: 0.10.0
libtpu: 0.0.40
codegen_flags: <defaults>
</compile_context>

<pallas_src>
import jax
import jax.numpy as jnp
from jax.experimental import pallas as pl
from jax.experimental.pallas import tpu as pltpu

LN_EPS = 1e-5


def _patch_merging_kernel(x_ref, g0_ref, b0_ref, g1_ref, b1_ref, w0_ref, w1_ref,
                          o_ref):
    # x_ref:  (tr, 2, Whp, 2C)  slab of `tr` half-resolution rows
    #         plane 0 (even input row) packs [x0 | x2]; plane 1 packs [x1 | x3]
    # g*/b*:  (1, 2C)           LayerNorm affine halves, f32, host-permuted
    # w*:     (2C, Co)          split reduction weight, MXU dtype, host-permuted
    # o_ref:  (tr, Whp, Co)
    tr, _, whp, c2 = x_ref.shape
    co = o_ref.shape[-1]
    n = tr * whp
    inv_c4 = 1.0 / (2 * c2)   # 1 / 4C

    x = x_ref[...]
    # All reshapes below act on f32 data whose second-to-minor extent (whp) is a
    # multiple of 8, so they are layout-preserving (no sublane retile).
    x0 = x[:, 0].astype(jnp.float32).reshape(n, c2)   # even-row plane [x0 | x2]
    x1 = x[:, 1].astype(jnp.float32).reshape(n, c2)   # odd-row plane  [x1 | x3]

    # Fused single-pass LayerNorm statistics over the full 4C feature vector.
    s = jnp.sum(x0, axis=-1, keepdims=True) + jnp.sum(x1, axis=-1, keepdims=True)
    sq = (jnp.sum(x0 * x0, axis=-1, keepdims=True)
          + jnp.sum(x1 * x1, axis=-1, keepdims=True))
    mean = s * inv_c4
    var = jnp.maximum(sq * inv_c4 - mean * mean, 0.0)
    rstd = jax.lax.rsqrt(var + LN_EPS)

    xn0 = (x0 - mean) * rstd * g0_ref[...] + b0_ref[...]
    xn1 = (x1 - mean) * rstd * g1_ref[...] + b1_ref[...]

    # Split-weight reduction: out = xn_even @ W_top + xn_odd @ W_bot (f32 accum,
    # bf16 MXU operands by default).
    acc = jnp.dot(xn0.astype(w0_ref.dtype), w0_ref[...],
                  preferred_element_type=jnp.float32)
    acc = acc + jnp.dot(xn1.astype(w1_ref.dtype), w1_ref[...],
                        preferred_element_type=jnp.float32)

    o_ref[...] = acc.reshape(tr, whp, co).astype(o_ref.dtype)


def _vmem_limit_bytes():
    # ~75% of per-core VMEM: ~96 MiB on v5e/v6e (128 MiB), ~48 MiB on v7x (64 MiB).
    try:
        cap = int(pltpu.get_tpu_info().vmem_capacity_bytes)
        return max(min(int(cap * 0.75), 112 * 1024 * 1024), 16 * 1024 * 1024)
    except Exception:
        return 48 * 1024 * 1024   # conservative: safe on every generation


def _pick_row_tile(R, whp, C, in_bytes, out_bytes, mxu_bytes, vmem_limit,
                   max_tokens=8192):
    """Half-resolution rows per grid step, derived from the VMEM budget."""
    c2, c4 = 2 * C, 4 * C
    # Constant operands (gamma/beta halves + split weight), double-buffered.
    const_bytes = 2 * (4 * c2 * 4 + 2 * c2 * c2 * mxu_bytes)
    budget = vmem_limit - const_bytes - (4 << 20)          # pipeline/compiler slack
    budget = max(budget, vmem_limit // 4)
    per_token = (2 * c4 * in_bytes        # input slab, double-buffered
                 + 2 * c2 * out_bytes     # output slab, double-buffered
                 + 14 * c4                # live f32 intermediates (~3.5 copies)
                 + 2 * c4 * mxu_bytes)    # normalized activations cast for the MXU
    tok_cap = min(max(budget // per_token, whp), max(max_tokens, whp))
    tr_vmem = max(1, min(R, int(tok_cap) // whp))

    # Prefer >= 8 grid steps (>= 4 per TensorCore on 2-core chips) so the
    # software pipeline has iterations to overlap.
    target_steps = 8 if R >= 8 else max(R, 1)
    tr = max(1, min(tr_vmem, max(1, R // target_steps)))
    # Amortize the per-step overhead: keep slabs >= ~512 tokens when the problem
    # size and VMEM budget allow it.
    if tr * whp < 512 and R * whp >= target_steps * 512:
        tr = max(tr, min(tr_vmem, pl.cdiv(512, whp)))
    return tr


def _run_pallas(x4, g0, b0, g1, b1, w0, w1, R, Wh, whp, out_dtype, vmem_limit):
    C2 = g0.shape[-1]
    C = C2 // 2
    Co = w0.shape[-1]
    out_bytes = jnp.dtype(out_dtype).itemsize
    tr = _pick_row_tile(R, whp, C, x4.dtype.itemsize, out_bytes,
                        w0.dtype.itemsize, vmem_limit)
    grid = (pl.cdiv(R, tr),)

    tokens = R * Wh
    cost = pl.CostEstimate(
        flops=2 * tokens * (4 * C) * Co + 12 * tokens * 4 * C,
        transcendentals=tokens,
        bytes_accessed=(tokens * 4 * C * x4.dtype.itemsize
                        + tokens * Co * out_bytes
                        + 2 * C2 * Co * w0.dtype.itemsize + 4 * C2 * 4),
    )

    return pl.pallas_call(
        _patch_merging_kernel,
        out_shape=jax.ShapeDtypeStruct((R, Wh, Co), out_dtype),
        grid_spec=pltpu.PrefetchScalarGridSpec(
            num_scalar_prefetch=0,
            grid=grid,
            in_specs=[
                pl.BlockSpec((tr, 2, whp, C2), lambda i: (i, 0, 0, 0)),
                pl.BlockSpec((1, C2), lambda i: (0, 0)),
                pl.BlockSpec((1, C2), lambda i: (0, 0)),
                pl.BlockSpec((1, C2), lambda i: (0, 0)),
                pl.BlockSpec((1, C2), lambda i: (0, 0)),
                pl.BlockSpec((C2, Co), lambda i: (0, 0)),
                pl.BlockSpec((C2, Co), lambda i: (0, 0)),
            ],
            out_specs=pl.BlockSpec((tr, whp, Co), lambda i: (i, 0, 0)),
        ),
        compiler_params=pltpu.CompilerParams(
            dimension_semantics=("parallel",),
            vmem_limit_bytes=vmem_limit,
        ),
        cost_estimate=cost,
    )(x4, g0, b0, g1, b1, w0, w1)


def patch_merging_forward(x, H, W, gamma, beta, w, *, mxu_dtype=jnp.bfloat16):
    """Matches PatchMerging.forward(x, H, W).

    x:      (B, H*W, C)
    gamma:  (4C,)     LayerNorm weight
    beta:   (4C,)     LayerNorm bias
    w:      (4C, 2C)  reduction weight (== nn.Linear(4C, 2C, bias=False).weight.T)
    mxu_dtype: dtype for the matmul operands (None = keep w's native dtype).
    returns (B, ceil(H/2)*ceil(W/2), 2C) in x.dtype.
    """
    B, L, C = x.shape
    assert L == H * W, "input feature has wrong size"
    C2 = 2 * C

    xs = x.reshape(B, H, W, C)
    pad_h, pad_w = H % 2, W % 2
    if pad_h or pad_w:
        # Module semantics (F.pad to even H/W); only hit for odd resolutions.
        xs = jnp.pad(xs, ((0, 0), (0, pad_h), (0, pad_w), (0, 0)))
    Hp, Wp = H + pad_h, W + pad_w
    Hh, Wh = Hp // 2, Wp // 2
    R = B * Hh

    # Free row-major view: (B, Hp, Wp, C) -> (R, 2, Wh, 2C).
    # Plane 0 (even rows) packs [x0 | x2]; plane 1 (odd rows) packs [x1 | x3].
    x4 = xs.reshape(R, 2, Wh, C2)

    # Host-side split/permutation of the tiny parameters into the kernel's
    # per-plane feature order (LayerNorm stats are permutation-invariant).
    g = gamma.astype(jnp.float32)
    b = beta.astype(jnp.float32)
    wm = w.astype(mxu_dtype) if mxu_dtype is not None else w
    g0 = jnp.concatenate([g[0:C], g[2 * C:3 * C]]).reshape(1, C2)
    g1 = jnp.concatenate([g[C:2 * C], g[3 * C:4 * C]]).reshape(1, C2)
    b0 = jnp.concatenate([b[0:C], b[2 * C:3 * C]]).reshape(1, C2)
    b1 = jnp.concatenate([b[C:2 * C], b[3 * C:4 * C]]).reshape(1, C2)
    w0 = jnp.concatenate([wm[0:C], wm[2 * C:3 * C]], axis=0)      # (2C, 2C_out)
    w1 = jnp.concatenate([wm[C:2 * C], wm[3 * C:4 * C]], axis=0)  # (2C, 2C_out)

    vmem_limit = _vmem_limit_bytes()
    # Pad the block's W/2 extent up to a sublane multiple so in-kernel reshapes
    # are layout-preserving; OOB rows are dropped by the masked output store.
    whp = ((Wh + 7) // 8) * 8
    try:
        out3 = _run_pallas(x4, g0, b0, g1, b1, w0, w1, R, Wh, whp,
                           x.dtype, vmem_limit)
    except Exception:
        # Conservative fallback: exact-width blocks (reshapes may retile but are
        # always legal).
        out3 = _run_pallas(x4, g0, b0, g1, b1, w0, w1, R, Wh, Wh,
                           x.dtype, vmem_limit)

    return out3.reshape(B, Hh * Wh, out3.shape[-1])


def _reference(x, H, W, gamma, beta, w, mxu_dtype=jnp.bfloat16):
    """Plain-JAX reference (same math as the PyTorch module, same MXU dtype)."""
    B, L, C = x.shape
    xr = x.reshape(B, H, W, C)
    if H % 2 or W % 2:
        xr = jnp.pad(xr, ((0, 0), (0, H % 2), (0, W % 2), (0, 0)))
    x0 = xr[:, 0::2, 0::2, :]
    x1 = xr[:, 1::2, 0::2, :]
    x2 = xr[:, 0::2, 1::2, :]
    x3 = xr[:, 1::2, 1::2, :]
    t = jnp.concatenate([x0, x1, x2, x3], axis=-1).reshape(B, -1, 4 * C)
    t = t.astype(jnp.float32)
    mu = jnp.mean(t, axis=-1, keepdims=True)
    var = jnp.mean((t - mu) ** 2, axis=-1, keepdims=True)
    xn = ((t - mu) * jax.lax.rsqrt(var + LN_EPS)) * gamma.astype(jnp.float32) \
        + beta.astype(jnp.float32)
    if mxu_dtype is not None:
        xn = xn.astype(mxu_dtype)
        wr = w.astype(mxu_dtype)
    else:
        wr = w
    out = jnp.einsum("blk,kn->bln", xn, wr, preferred_element_type=jnp.float32)
    return out.astype(x.dtype)


if __name__ == "__main__":
    def run_case(key, B, H, W, C):
        kx, kw, kg, kb = jax.random.split(key, 4)
        x = jax.random.normal(kx, (B, H * W, C), dtype=jnp.float32)
        gamma = 1.0 + 0.1 * jax.random.normal(kg, (4 * C,), dtype=jnp.float32)
        beta = 0.05 * jax.random.normal(kb, (4 * C,), dtype=jnp.float32)
        w = 0.02 * jax.random.normal(kw, (4 * C, 2 * C), dtype=jnp.float32)

        out = patch_merging_forward(x, H, W, gamma, beta, w)
        out = jax.block_until_ready(out)
        ref = _reference(x, H, W, gamma, beta, w)
        Hh, Wh = (H + H % 2) // 2, (W + W % 2) // 2
        assert out.shape == (B, Hh * Wh, 2 * C), out.shape
        err = float(jnp.max(jnp.abs(out.astype(jnp.float32) -
                                    ref.astype(jnp.float32))))
        assert jnp.allclose(out, ref, atol=2e-2, rtol=2e-2), err

    key = jax.random.PRNGKey(0)
    k1, k2 = jax.random.split(key)
    run_case(k1, B=2, H=8, W=8, C=32)    # even H/W; Wh=4 padded to 8 in the block
    run_case(k2, B=1, H=7, W=10, C=48)   # odd H (module pad path); ragged Wh=5
    print("KERNEL_OK")
</pallas_src>

<mosaic_0001>
module attributes {stable_mosaic.version = 11 : i64} {
  func.func @_patch_merging_kernel(%arg0: i32, %arg1: memref<1x2x8x64xf32, #tpu.memory_space<vmem>>, %arg2: memref<1x64xf32, #tpu.memory_space<vmem>>, %arg3: memref<1x64xf32, #tpu.memory_space<vmem>>, %arg4: memref<1x64xf32, #tpu.memory_space<vmem>>, %arg5: memref<1x64xf32, #tpu.memory_space<vmem>>, %arg6: memref<64x64xbf16, #tpu.memory_space<vmem>>, %arg7: memref<64x64xbf16, #tpu.memory_space<vmem>>, %arg8: memref<1x8x64xf32, #tpu.memory_space<vmem>>) attributes {dimension_semantics = [#tpu.dimension_semantics<parallel>], iteration_bounds = array<i64: 8>, scalar_prefetch = 0 : i64, scratch_operands = 0 : i64, tpu.core_type = #tpu.core_type<tc>, window_params = [{transform_indices = @transform_0, window_bounds = array<i64: 1, 2, 8, 64>}, {pipeline_mode = #tpu.pipeline_mode<synchronous>, transform_indices = @transform_1, window_bounds = array<i64: 1, 64>}, {pipeline_mode = #tpu.pipeline_mode<synchronous>, transform_indices = @transform_2, window_bounds = array<i64: 1, 64>}, {pipeline_mode = #tpu.pipeline_mode<synchronous>, transform_indices = @transform_3, window_bounds = array<i64: 1, 64>}, {pipeline_mode = #tpu.pipeline_mode<synchronous>, transform_indices = @transform_4, window_bounds = array<i64: 1, 64>}, {pipeline_mode = #tpu.pipeline_mode<synchronous>, transform_indices = @transform_5, window_bounds = array<i64: 64, 64>}, {pipeline_mode = #tpu.pipeline_mode<synchronous>, transform_indices = @transform_6, window_bounds = array<i64: 64, 64>}, {transform_indices = @transform_7, window_bounds = array<i64: 1, 8, 64>}]} {
    %c0 = arith.constant 0 : index
    %c0_0 = arith.constant 0 : index
    %c0_1 = arith.constant 0 : index
    %c0_2 = arith.constant 0 : index
    %0 = vector.load %arg1[%c0, %c0_0, %c0_1, %c0_2] : memref<1x2x8x64xf32, #tpu.memory_space<vmem>>, vector<1x2x8x64xf32>
    %1 = vector.extract_strided_slice %0 {offsets = [0, 0, 0, 0], sizes = [1, 1, 8, 64], strides = [1, 1, 1, 1]} : vector<1x2x8x64xf32> to vector<1x1x8x64xf32>
    %2 = vector.shape_cast %1 : vector<1x1x8x64xf32> to vector<1x8x64xf32>
    %3 = vector.shape_cast %2 : vector<1x8x64xf32> to vector<8x64xf32>
    %4 = vector.extract_strided_slice %0 {offsets = [0, 1, 0, 0], sizes = [1, 1, 8, 64], strides = [1, 1, 1, 1]} : vector<1x2x8x64xf32> to vector<1x1x8x64xf32>
    %5 = vector.shape_cast %4 : vector<1x1x8x64xf32> to vector<1x8x64xf32>
    %6 = vector.shape_cast %5 : vector<1x8x64xf32> to vector<8x64xf32>
    %cst = arith.constant dense<0.000000e+00> : vector<8xf32>
    %7 = vector.multi_reduction <add>, %3, %cst [1] : vector<8x64xf32> to vector<8xf32>
    %8 = vector.shape_cast %7 : vector<8xf32> to vector<8x1xf32>
    %cst_3 = arith.constant dense<0.000000e+00> : vector<8xf32>
    %9 = vector.multi_reduction <add>, %6, %cst_3 [1] : vector<8x64xf32> to vector<8xf32>
    %10 = vector.shape_cast %9 : vector<8xf32> to vector<8x1xf32>
    %11 = arith.addf %8, %10 : vector<8x1xf32>
    %12 = arith.mulf %3, %3 : vector<8x64xf32>
    %cst_4 = arith.constant dense<0.000000e+00> : vector<8xf32>
    %13 = vector.multi_reduction <add>, %12, %cst_4 [1] : vector<8x64xf32> to vector<8xf32>
    %14 = vector.shape_cast %13 : vector<8xf32> to vector<8x1xf32>
    %15 = arith.mulf %6, %6 : vector<8x64xf32>
    %cst_5 = arith.constant dense<0.000000e+00> : vector<8xf32>
    %16 = vector.multi_reduction <add>, %15, %cst_5 [1] : vector<8x64xf32> to vector<8xf32>
    %17 = vector.shape_cast %16 : vector<8xf32> to vector<8x1xf32>
    %18 = arith.addf %14, %17 : vector<8x1xf32>
    %cst_6 = arith.constant 7.812500e-03 : f32
    %19 = vector.broadcast %cst_6 : f32 to vector<8x1xf32>
    %20 = arith.mulf %11, %19 : vector<8x1xf32>
    %cst_7 = arith.constant 7.812500e-03 : f32
    %21 = vector.broadcast %cst_7 : f32 to vector<8x1xf32>
    %22 = arith.mulf %18, %21 : vector<8x1xf32>
    %23 = arith.mulf %20, %20 : vector<8x1xf32>
    %24 = arith.subf %22, %23 : vector<8x1xf32>
    %cst_8 = arith.constant 0.000000e+00 : f32
    %25 = vector.broadcast %cst_8 : f32 to vector<8x1xf32>
    %26 = arith.maximumf %24, %25 : vector<8x1xf32>
    %cst_9 = arith.constant 9.99999974E-6 : f32
    %27 = vector.broadcast %cst_9 : f32 to vector<8x1xf32>
    %28 = arith.addf %26, %27 : vector<8x1xf32>
    %29 = math.rsqrt %28 : vector<8x1xf32>
    %30 = vector.broadcast %20 : vector<8x1xf32> to vector<8x64xf32>
    %31 = arith.subf %3, %30 : vector<8x64xf32>
    %32 = vector.broadcast %29 : vector<8x1xf32> to vector<8x64xf32>
    %33 = arith.mulf %31, %32 : vector<8x64xf32>
    %c0_10 = arith.constant 0 : index
    %c0_11 = arith.constant 0 : index
    %34 = vector.load %arg2[%c0_10, %c0_11] : memref<1x64xf32, #tpu.memory_space<vmem>>, vector<1x64xf32>
    %35 = vector.broadcast %34 : vector<1x64xf32> to vector<8x64xf32>
    %36 = arith.mulf %33, %35 : vector<8x64xf32>
    %c0_12 = arith.constant 0 : index
    %c0_13 = arith.constant 0 : index
    %37 = vector.load %arg3[%c0_12, %c0_13] : memref<1x64xf32, #tpu.memory_space<vmem>>, vector<1x64xf32>
    %38 = vector.broadcast %37 : vector<1x64xf32> to vector<8x64xf32>
    %39 = arith.addf %36, %38 : vector<8x64xf32>
    %40 = vector.broadcast %20 : vector<8x1xf32> to vector<8x64xf32>
    %41 = arith.subf %6, %40 : vector<8x64xf32>
    %42 = vector.broadcast %29 : vector<8x1xf32> to vector<8x64xf32>
    %43 = arith.mulf %41, %42 : vector<8x64xf32>
    %c0_14 = arith.constant 0 : index
    %c0_15 = arith.constant 0 : index
    %44 = vector.load %arg4[%c0_14, %c0_15] : memref<1x64xf32, #tpu.memory_space<vmem>>, vector<1x64xf32>
    %45 = vector.broadcast %44 : vector<1x64xf32> to vector<8x64xf32>
    %46 = arith.mulf %43, %45 : vector<8x64xf32>
    %c0_16 = arith.constant 0 : index
    %c0_17 = arith.constant 0 : index
    %47 = vector.load %arg5[%c0_16, %c0_17] : memref<1x64xf32, #tpu.memory_space<vmem>>, vector<1x64xf32>
    %48 = vector.broadcast %47 : vector<1x64xf32> to vector<8x64xf32>
    %49 = arith.addf %46, %48 : vector<8x64xf32>
    %50 = arith.truncf %39 : vector<8x64xf32> to vector<8x64xbf16>
    %c0_18 = arith.constant 0 : index
    %c0_19 = arith.constant 0 : index
    %51 = vector.load %arg6[%c0_18, %c0_19] : memref<64x64xbf16, #tpu.memory_space<vmem>>, vector<64x64xbf16>
    %cst_20 = arith.constant dense<0.000000e+00> : vector<8x64xf32>
    %52 = tpu.matmul %50, %51, %cst_20 {dimension_numbers = #tpu.dot_dimension_numbers<[1], [0], [0], [1], [0, 0, 1, 1], [], []>} : vector<8x64xbf16>, vector<64x64xbf16>, vector<8x64xf32> -> vector<8x64xf32>
    %53 = arith.truncf %49 : vector<8x64xf32> to vector<8x64xbf16>
    %c0_21 = arith.constant 0 : index
    %c0_22 = arith.constant 0 : index
    %54 = vector.load %arg7[%c0_21, %c0_22] : memref<64x64xbf16, #tpu.memory_space<vmem>>, vector<64x64xbf16>
    %cst_23 = arith.constant dense<0.000000e+00> : vector<8x64xf32>
    %55 = tpu.matmul %53, %54, %cst_23 {dimension_numbers = #tpu.dot_dimension_numbers<[1], [0], [0], [1], [0, 0, 1, 1], [], []>} : vector<8x64xbf16>, vector<64x64xbf16>, vector<8x64xf32> -> vector<8x64xf32>
    %56 = arith.addf %52, %55 : vector<8x64xf32>
    %57 = vector.shape_cast %56 : vector<8x64xf32> to vector<1x8x64xf32>
    %c0_24 = arith.constant 0 : index
    %c0_25 = arith.constant 0 : index
    %c0_26 = arith.constant 0 : index
    %58 = vector.load %arg8[%c0_24, %c0_25, %c0_26] : memref<1x8x64xf32, #tpu.memory_space<vmem>>, vector<1x8x64xf32>
    tpu.vector_store %arg8[%c0_24, %c0_25, %c0_26], %57 {strides = array<i32>} : memref<1x8x64xf32, #tpu.memory_space<vmem>>, vector<1x8x64xf32>,
    return
  }
  func.func @transform_0(%arg0: i32) -> (i32, i32, i32, i32) {
    %c0_i32 = arith.constant 0 : i32
    %c0_i32_0 = arith.constant 0 : i32
    %c0_i32_1 = arith.constant 0 : i32
    %c0_i32_2 = arith.constant 0 : i32
    return %arg0, %c0_i32, %c0_i32_0, %c0_i32_1 : i32, i32, i32, i32
  }
  func.func @transform_1(%arg0: i32) -> (i32, i32) {
    %c0_i32 = arith.constant 0 : i32
    %c0_i32_0 = arith.constant 0 : i32
    %c0_i32_1 = arith.constant 0 : i32
    return %c0_i32, %c0_i32_0 : i32, i32
  }
  func.func @transform_2(%arg0: i32) -> (i32, i32) {
    %c0_i32 = arith.constant 0 : i32
    %c0_i32_0 = arith.constant 0 : i32
    %c0_i32_1 = arith.constant 0 : i32
    return %c0_i32, %c0_i32_0 : i32, i32
  }
  func.func @transform_3(%arg0: i32) -> (i32, i32) {
    %c0_i32 = arith.constant 0 : i32
    %c0_i32_0 = arith.constant 0 : i32
    %c0_i32_1 = arith.constant 0 : i32
    return %c0_i32, %c0_i32_0 : i32, i32
  }
  func.func @transform_4(%arg0: i32) -> (i32, i32) {
    %c0_i32 = arith.constant 0 : i32
    %c0_i32_0 = arith.constant 0 : i32
    %c0_i32_1 = arith.constant 0 : i32
    return %c0_i32, %c0_i32_0 : i32, i32
  }
  func.func @transform_5(%arg0: i32) -> (i32, i32) {
    %c0_i32 = arith.constant 0 : i32
    %c0_i32_0 = arith.constant 0 : i32
    %c0_i32_1 = arith.constant 0 : i32
    return %c0_i32, %c0_i32_0 : i32, i32
  }
  func.func @transform_6(%arg0: i32) -> (i32, i32) {
    %c0_i32 = arith.constant 0 : i32
    %c0_i32_0 = arith.constant 0 : i32
    %c0_i32_1 = arith.constant 0 : i32
    return %c0_i32, %c0_i32_0 : i32, i32
  }
  func.func @transform_7(%arg0: i32) -> (i32, i32, i32) {
    %c0_i32 = arith.constant 0 : i32
    %c0_i32_0 = arith.constant 0 : i32
    %c0_i32_1 = arith.constant 0 : i32
    return %arg0, %c0_i32, %c0_i32_0 : i32, i32, i32
  }
}

module attributes {stable_mosaic.version = 11 : i64} {
  func.func @_patch_merging_kernel(%arg0: i32, %arg1: memref<1x2x4x64xf32, #tpu.memory_space<vmem>>, %arg2: memref<1x64xf32, #tpu.memory_space<vmem>>, %arg3: memref<1x64xf32, #tpu.memory_space<vmem>>, %arg4: memref<1x64xf32, #tpu.memory_space<vmem>>, %arg5: memref<1x64xf32, #tpu.memory_space<vmem>>, %arg6: memref<64x64xbf16, #tpu.memory_space<vmem>>, %arg7: memref<64x64xbf16, #tpu.memory_space<vmem>>, %arg8: memref<1x4x64xf32, #tpu.memory_space<vmem>>) attributes {dimension_semantics = [#tpu.dimension_semantics<parallel>], iteration_bounds = array<i64: 8>, scalar_prefetch = 0 : i64, scratch_operands = 0 : i64, tpu.core_type = #tpu.core_type<tc>, window_params = [{transform_indices = @transform_0, window_bounds = array<i64: 1, 2, 4, 64>}, {pipeline_mode = #tpu.pipeline_mode<synchronous>, transform_indices = @transform_1, window_bounds = array<i64: 1, 64>}, {pipeline_mode = #tpu.pipeline_mode<synchronous>, transform_indices = @transform_2, window_bounds = array<i64: 1, 64>}, {pipeline_mode = #tpu.pipeline_mode<synchronous>, transform_indices = @transform_3, window_bounds = array<i64: 1, 64>}, {pipeline_mode = #tpu.pipeline_mode<synchronous>, transform_indices = @transform_4, window_bounds = array<i64: 1, 64>}, {pipeline_mode = #tpu.pipeline_mode<synchronous>, transform_indices = @transform_5, window_bounds = array<i64: 64, 64>}, {pipeline_mode = #tpu.pipeline_mode<synchronous>, transform_indices = @transform_6, window_bounds = array<i64: 64, 64>}, {transform_indices = @transform_7, window_bounds = array<i64: 1, 4, 64>}]} {
    %c0 = arith.constant 0 : index
    %c0_0 = arith.constant 0 : index
    %c0_1 = arith.constant 0 : index
    %c0_2 = arith.constant 0 : index
    %0 = vector.load %arg1[%c0, %c0_0, %c0_1, %c0_2] : memref<1x2x4x64xf32, #tpu.memory_space<vmem>>, vector<1x2x4x64xf32>
    %1 = vector.extract_strided_slice %0 {offsets = [0, 0, 0, 0], sizes = [1, 1, 4, 64], strides = [1, 1, 1, 1]} : vector<1x2x4x64xf32> to vector<1x1x4x64xf32>
    %2 = vector.shape_cast %1 : vector<1x1x4x64xf32> to vector<1x4x64xf32>
    %3 = vector.shape_cast %2 : vector<1x4x64xf32> to vector<4x64xf32>
    %4 = vector.extract_strided_slice %0 {offsets = [0, 1, 0, 0], sizes = [1, 1, 4, 64], strides = [1, 1, 1, 1]} : vector<1x2x4x64xf32> to vector<1x1x4x64xf32>
    %5 = vector.shape_cast %4 : vector<1x1x4x64xf32> to vector<1x4x64xf32>
    %6 = vector.shape_cast %5 : vector<1x4x64xf32> to vector<4x64xf32>
    %cst = arith.constant dense<0.000000e+00> : vector<4xf32>
    %7 = vector.multi_reduction <add>, %3, %cst [1] : vector<4x64xf32> to vector<4xf32>
    %8 = vector.shape_cast %7 : vector<4xf32> to vector<4x1xf32>
    %cst_3 = arith.constant dense<0.000000e+00> : vector<4xf32>
    %9 = vector.multi_reduction <add>, %6, %cst_3 [1] : vector<4x64xf32> to vector<4xf32>
    %10 = vector.shape_cast %9 : vector<4xf32> to vector<4x1xf32>
    %11 = arith.addf %8, %10 : vector<4x1xf32>
    %12 = arith.mulf %3, %3 : vector<4x64xf32>
    %cst_4 = arith.constant dense<0.000000e+00> : vector<4xf32>
    %13 = vector.multi_reduction <add>, %12, %cst_4 [1] : vector<4x64xf32> to vector<4xf32>
    %14 = vector.shape_cast %13 : vector<4xf32> to vector<4x1xf32>
    %15 = arith.mulf %6, %6 : vector<4x64xf32>
    %cst_5 = arith.constant dense<0.000000e+00> : vector<4xf32>
    %16 = vector.multi_reduction <add>, %15, %cst_5 [1] : vector<4x64xf32> to vector<4xf32>
    %17 = vector.shape_cast %16 : vector<4xf32> to vector<4x1xf32>
    %18 = arith.addf %14, %17 : vector<4x1xf32>
    %cst_6 = arith.constant 7.812500e-03 : f32
    %19 = vector.broadcast %cst_6 : f32 to vector<4x1xf32>
    %20 = arith.mulf %11, %19 : vector<4x1xf32>
    %cst_7 = arith.constant 7.812500e-03 : f32
    %21 = vector.broadcast %cst_7 : f32 to vector<4x1xf32>
    %22 = arith.mulf %18, %21 : vector<4x1xf32>
    %23 = arith.mulf %20, %20 : vector<4x1xf32>
    %24 = arith.subf %22, %23 : vector<4x1xf32>
    %cst_8 = arith.constant 0.000000e+00 : f32
    %25 = vector.broadcast %cst_8 : f32 to vector<4x1xf32>
    %26 = arith.maximumf %24, %25 : vector<4x1xf32>
    %cst_9 = arith.constant 9.99999974E-6 : f32
    %27 = vector.broadcast %cst_9 : f32 to vector<4x1xf32>
    %28 = arith.addf %26, %27 : vector<4x1xf32>
    %29 = math.rsqrt %28 : vector<4x1xf32>
    %30 = vector.broadcast %20 : vector<4x1xf32> to vector<4x64xf32>
    %31 = arith.subf %3, %30 : vector<4x64xf32>
    %32 = vector.broadcast %29 : vector<4x1xf32> to vector<4x64xf32>
    %33 = arith.mulf %31, %32 : vector<4x64xf32>
    %c0_10 = arith.constant 0 : index
    %c0_11 = arith.constant 0 : index
    %34 = vector.load %arg2[%c0_10, %c0_11] : memref<1x64xf32, #tpu.memory_space<vmem>>, vector<1x64xf32>
    %35 = vector.broadcast %34 : vector<1x64xf32> to vector<4x64xf32>
    %36 = arith.mulf %33, %35 : vector<4x64xf32>
    %c0_12 = arith.constant 0 : index
    %c0_13 = arith.constant 0 : index
    %37 = vector.load %arg3[%c0_12, %c0_13] : memref<1x64xf32, #tpu.memory_space<vmem>>, vector<1x64xf32>
    %38 = vector.broadcast %37 : vector<1x64xf32> to vector<4x64xf32>
    %39 = arith.addf %36, %38 : vector<4x64xf32>
    %40 = vector.broadcast %20 : vector<4x1xf32> to vector<4x64xf32>
    %41 = arith.subf %6, %40 : vector<4x64xf32>
    %42 = vector.broadcast %29 : vector<4x1xf32> to vector<4x64xf32>
    %43 = arith.mulf %41, %42 : vector<4x64xf32>
    %c0_14 = arith.constant 0 : index
    %c0_15 = arith.constant 0 : index
    %44 = vector.load %arg4[%c0_14, %c0_15] : memref<1x64xf32, #tpu.memory_space<vmem>>, vector<1x64xf32>
    %45 = vector.broadcast %44 : vector<1x64xf32> to vector<4x64xf32>
    %46 = arith.mulf %43, %45 : vector<4x64xf32>
    %c0_16 = arith.constant 0 : index
    %c0_17 = arith.constant 0 : index
    %47 = vector.load %arg5[%c0_16, %c0_17] : memref<1x64xf32, #tpu.memory_space<vmem>>, vector<1x64xf32>
    %48 = vector.broadcast %47 : vector<1x64xf32> to vector<4x64xf32>
    %49 = arith.addf %46, %48 : vector<4x64xf32>
    %50 = arith.truncf %39 : vector<4x64xf32> to vector<4x64xbf16>
    %c0_18 = arith.constant 0 : index
    %c0_19 = arith.constant 0 : index
    %51 = vector.load %arg6[%c0_18, %c0_19] : memref<64x64xbf16, #tpu.memory_space<vmem>>, vector<64x64xbf16>
    %cst_20 = arith.constant dense<0.000000e+00> : vector<4x64xf32>
    %52 = tpu.matmul %50, %51, %cst_20 {dimension_numbers = #tpu.dot_dimension_numbers<[1], [0], [0], [1], [0, 0, 1, 1], [], []>} : vector<4x64xbf16>, vector<64x64xbf16>, vector<4x64xf32> -> vector<4x64xf32>
    %53 = arith.truncf %49 : vector<4x64xf32> to vector<4x64xbf16>
    %c0_21 = arith.constant 0 : index
    %c0_22 = arith.constant 0 : index
    %54 = vector.load %arg7[%c0_21, %c0_22] : memref<64x64xbf16, #tpu.memory_space<vmem>>, vector<64x64xbf16>
    %cst_23 = arith.constant dense<0.000000e+00> : vector<4x64xf32>
    %55 = tpu.matmul %53, %54, %cst_23 {dimension_numbers = #tpu.dot_dimension_numbers<[1], [0], [0], [1], [0, 0, 1, 1], [], []>} : vector<4x64xbf16>, vector<64x64xbf16>, vector<4x64xf32> -> vector<4x64xf32>
    %56 = arith.addf %52, %55 : vector<4x64xf32>
    %57 = vector.shape_cast %56 : vector<4x64xf32> to vector<1x4x64xf32>
    %c0_24 = arith.constant 0 : index
    %c0_25 = arith.constant 0 : index
    %c0_26 = arith.constant 0 : index
    %58 = vector.load %arg8[%c0_24, %c0_25, %c0_26] : memref<1x4x64xf32, #tpu.memory_space<vmem>>, vector<1x4x64xf32>
    tpu.vector_store %arg8[%c0_24, %c0_25, %c0_26], %57 {strides = array<i32>} : memref<1x4x64xf32, #tpu.memory_space<vmem>>, vector<1x4x64xf32>,
    return
  }
  func.func @transform_0(%arg0: i32) -> (i32, i32, i32, i32) {
    %c0_i32 = arith.constant 0 : i32
    %c0_i32_0 = arith.constant 0 : i32
    %c0_i32_1 = arith.constant 0 : i32
    %c0_i32_2 = arith.constant 0 : i32
    return %arg0, %c0_i32, %c0_i32_0, %c0_i32_1 : i32, i32, i32, i32
  }
  func.func @transform_1(%arg0: i32) -> (i32, i32) {
    %c0_i32 = arith.constant 0 : i32
    %c0_i32_0 = arith.constant 0 : i32
    %c0_i32_1 = arith.constant 0 : i32
    return %c0_i32, %c0_i32_0 : i32, i32
  }
  func.func @transform_2(%arg0: i32) -> (i32, i32) {
    %c0_i32 = arith.constant 0 : i32
    %c0_i32_0 = arith.constant 0 : i32
    %c0_i32_1 = arith.constant 0 : i32
    return %c0_i32, %c0_i32_0 : i32, i32
  }
  func.func @transform_3(%arg0: i32) -> (i32, i32) {
    %c0_i32 = arith.constant 0 : i32
    %c0_i32_0 = arith.constant 0 : i32
    %c0_i32_1 = arith.constant 0 : i32
    return %c0_i32, %c0_i32_0 : i32, i32
  }
  func.func @transform_4(%arg0: i32) -> (i32, i32) {
    %c0_i32 = arith.constant 0 : i32
    %c0_i32_0 = arith.constant 0 : i32
    %c0_i32_1 = arith.constant 0 : i32
    return %c0_i32, %c0_i32_0 : i32, i32
  }
  func.func @transform_5(%arg0: i32) -> (i32, i32) {
    %c0_i32 = arith.constant 0 : i32
    %c0_i32_0 = arith.constant 0 : i32
    %c0_i32_1 = arith.constant 0 : i32
    return %c0_i32, %c0_i32_0 : i32, i32
  }
  func.func @transform_6(%arg0: i32) -> (i32, i32) {
    %c0_i32 = arith.constant 0 : i32
    %c0_i32_0 = arith.constant 0 : i32
    %c0_i32_1 = arith.constant 0 : i32
    return %c0_i32, %c0_i32_0 : i32, i32
  }
  func.func @transform_7(%arg0: i32) -> (i32, i32, i32) {
    %c0_i32 = arith.constant 0 : i32
    %c0_i32_0 = arith.constant 0 : i32
    %c0_i32_1 = arith.constant 0 : i32
    return %arg0, %c0_i32, %c0_i32_0 : i32, i32, i32
  }
}

</mosaic_0001>

<bundles_post_ra>
// kernel: tpu_custom_call.1
= control target key start
LH: loop header
LB: loop body
LE: loop exit
PB: predicated region body
PF: predicated region fallthrough
CT: control target
= control target key end

     0   :  { %12 = vsyncpa [#allocation3], 0  ;;  %s1205_s0 = inlined_call_operand.hbm [shape: f32[8,2,4,64], index: 0, kind: input, shape index: {}]   ;;  %s1206_s1 = inlined_call_operand.vmem [shape: f32[1,64], index: 1, kind: input, shape index: {}]   ;;  %s1207_s2 = inlined_call_operand.vmem [shape: f32[1,64], index: 2, kind: input, shape index: {}]   ;;  %s1208_s3 = inlined_call_operand.vmem [shape: f32[1,64], index: 3, kind: input, shape index: {}]   ;;  %s1209_s4 = inlined_call_operand.vmem [shape: f32[1,64], index: 4, kind: input, shape index: {}]   ;;  %s1210_s5 = inlined_call_operand.hbm [shape: bf16[64,64], index: 5, kind: input, shape index: {}]   ;;  %s1211_s6 = inlined_call_operand.hbm [shape: bf16[64,64], index: 6, kind: input, shape index: {}]   ;;  %s1212_s7 = inlined_call_operand.hbm [shape: f32[8,4,64], index: 7, kind: output, shape index: {}]  }
   0x1   :  { %14 = vsyncpa [#allocation3 + $0x1], 0 }
   0x2   :  { %15 = vsyncpa [#allocation6], 0 }
   0x3   :  { %16 = vsyncpa [#allocation4], 0 }
   0x4   :  { %18 = vsyncpa [#allocation4 + $0x1], 0  ;;  %s1000_s24 = smov 0   ;;  %s1002_s25 = smov 0  }
   0x5   :  { %s1004_s26 = smov 0   ;;  %s1006_s27 = smov 0  }
   0x6 LB: > { %s1021_s28 = sadd.s32 4294967295, %s944_s27   ;;  %s672_s29 = sadd.s32 4294967294, %s944_s27   ;;  %s944_s27 = sphi %s1006_s27, %s1236_s27   ;;  %s940_s26 = sphi %s1004_s26, %s1240_s26   ;;  %s936_s25 = sphi %s1002_s25, %s1239_s25   ;;  %s932_s24 = sphi %s1000_s24, %s1238_s24  }
   0x7   : > { %s1025_s30 = sadd.s32 1, %s944_s27   ;;  %s31_s8 = sadd.s32 1, %s940_s26 }
   0x8   : > { %1219 = sst [smem:[#allocation14_spill]] %s1025_s30  ;;  %s28_s9 = ssub.s32 %s944_s27, %s1025_s30 }
   0x9   : > { %p38_p0 = scmp.ne.s32.totalorder %s940_s26, %s936_s25  ;;  %p29_p1 = scmp.eq.s32.totalorder %s28_s9, 0 }
   0xa   : > { %p39_p2 = scmp.eq.s32.totalorder %s944_s27, 0  ;;  %p44_p3 = scmp.ne.s32.totalorder %s936_s25, %s932_s24 }
   0xb   : > { %p1213_p4 = scmp.eq.s32.totalorder %s1021_s28, 0  ;;  %p194_p7 = scmp.eq.s32.totalorder %s1021_s28, 7 }
   0xc   : > { %s1037_s10 = scalar_select %p29_p1, %s940_s26, %s31_s8  }
   0xd   : > { %p1039_p5 = por %p39_p2, %p38_p0  ;;  %p1045_p6 = por %p1213_p4, %p44_p3 }
   0xe   : > { %1220 = sst [smem:[#allocation15_spill]] %s1037_s10  ;;  %p200_p8 = scmp.eq.s32.totalorder %s672_s29, 7 }
   0xf   : > { %s1221_s11 = scalar_select %p1039_p5, 1, 0 }
  0x10   : > { %s1222_s12 = scalar_select %p1045_p6, 1, 0 }
  0x11   : > { %p673_p9 = scmp.ge.s32.totalorder %s944_s27, 1  ;;  %p207_p10 = scmp.lt.s32.totalorder %s944_s27, 9 }
  0x12   : > { %p1052_p11 = por %p194_p7, %p38_p0  ;;  %p1056_p12 = por %p200_p8, %p44_p3 }
  0x13   : > { %p1060_p13 = pnand %p673_p9, %p207_p10  ;;  %s946_s16 = smov [#allocation5]  }
  0x14   : > { %s1223_s13 = scalar_select %p1052_p11, 1, 0 }
  0x15   : > { %s1224_s14 = scalar_select %p1056_p12, 1, 0 }
  0x16   : > { %s1226_s15 = scalar_select %p1060_p13, 1, 0 }
  0x17   : > { %1225 = sst [smem:[#allocation16_spill]] %s1224_s14  ;;  %p751_p1 = pneg %p1060_p13 }
  0x18   : > { %s231_s17 = sshll.u32 %s946_s16, 4  ;;  %s947_s19 = smov [#allocation7]   ;;  %s232_s17 = int_to_ptr.vmem [resolvable:$true] %s231_s17 }
  0x19   : > { %p1068_p2 = pnand %p751_p1, %p1213_p4  ;;  %s244_s20 = sshll.u32 %s947_s19, 4  ;;  %s1072_s20 = int_to_ptr.vmem [resolvable:$true] %s244_s20 }
  0x1a   : > { %s822_s23 = scalar_lea.hbm %s1210_s5, 512 }
  0x1b   : > { %p823_p0 = scmp.ne.s32.totalorder %s1210_s5, %s822_s23  ;;  %p824_p3 = pneg %p1068_p2 }
  0x1c   : > { %p829_p9 = scmp.lt.u32.totalorder %s822_s23, %s1210_s5 }
  0x1d   : > { %p825_p7 = pnand %p824_p3, %p823_p0 }
  0x1f   : > { %p826_p8 = pneg %p825_p7 }
  0x21   : > { %p831_p10 = pnand %p829_p9, %p826_p8 }
  0x23   : > { %834 = shalt.err (!%p831_p10)
}
  0x24   : > { %s835_s19 = scalar_lea.vmem %s232_s17, 512  ;;  %p843_p11 = scmp.lt.s32.totalorder %s232_s17, %s232_s17 }
  0x25   : > { %p836_p1 = scmp.ne.s32.totalorder %s232_s17, %s835_s19  ;;  %p844_p6 = scmp.lt.s32.totalorder %s835_s19, %s835_s19 }
  0x27   : > { %p838_p4 = pnand %p836_p1, %p824_p3  ;;  %p845_p13 = por %p844_p6, %p843_p11 }
  0x29   : > { %p839_p12 = pneg %p838_p4 }
  0x2b   : > { %p846_p5 = pnand %p845_p13, %p839_p12 }
  0x2d   : > { %849 = shalt.err (!%p846_p5)
}
  0x2e   : > { %s948_s21 = smov 64   ;;  %s949_s22 = smov 4  }
  0x2f   : > { %754 = dma.hbm_to_vmem [thread:$0]  (!%p1068_p2), %s1210_s5, 512, %s232_s17, [#allocation6], %s948_s21, %s948_s21, %s949_s22  }
  0x30   : > { %s850_s16 = scalar_lea.hbm %s1211_s6, 512 }
  0x31   : > { %p851_p4 = scmp.ne.s32.totalorder %s1211_s6, %s850_s16  ;;  %p857_p11 = scmp.lt.u32.totalorder %s850_s16, %s1211_s6 }
  0x33   : > { %p853_p5 = pnand %p851_p4, %p824_p3 }
  0x35   : > { %p854_p6 = pneg %p853_p5 }
  0x37   : > { %p859_p12 = pnand %p857_p11, %p854_p6 }
  0x39   : > { %862 = shalt.err (!%p859_p12)
}
  0x3a   : > { %s863_s17 = scalar_lea.vmem %s1072_s20, 512  ;;  %p871_p8 = scmp.lt.s32.totalorder %s1072_s20, %s1072_s20 }
  0x3b   : > { %p864_p13 = scmp.ne.s32.totalorder %s1072_s20, %s863_s17  ;;  %p872_p9 = scmp.lt.s32.totalorder %s863_s17, %s863_s17 }
  0x3d   : > { %p866_p0 = pnand %p864_p13, %p824_p3  ;;  %p873_p10 = por %p872_p9, %p871_p8 }
  0x3f   : > { %p867_p7 = pneg %p866_p0 }
  0x41   : > { %p874_p1 = pnand %p873_p10, %p867_p7 }
  0x43   : > { %877 = shalt.err (!%p874_p1)
}
  0x44   : > { %757 = dma.hbm_to_vmem [thread:$0]  (!%p1068_p2), %s1211_s6, 512, %s1072_s20, [#allocation6], %s948_s21, %s948_s21, %s949_s22  }
  0x45   : > { %p676_p4 = scmp.ge.s32.totalorder %s944_s27, 8 }
  0x46   : > { %p1228_p5 = scmp.ne.s32.totalorder (!%p676_p4), %s1221_s11, 0 }
  0x47   : > { %254 = sbr.rel (%p676_p4) target bundleno = 98 (0x62), region = 40 }
  0x4e   : > { %257 = sbr.rel (!%p1228_p5) target bundleno = 98 (0x62), region = 44 }
  0x55   : > { %s258_s14 = sand.u32 1, %s940_s26  }
  0x56   : > { %s677_s23 = sshll.u32 %s258_s14, 4  ;;  %s259_s29 = scalar_lea.sflag [#allocation3], %s258_s14 }
  0x57   : > { %s262_s8 = scalar_lea.vmem [#allocation2], %s677_s23 }
  0x58   : > { %265 = vsyncadd %s259_s29, 128  ;;  %s705_s9 = sshll.u32 %s944_s27, 7  ;;  %s273_s18 = sld [smem:[#allocation0]]  }
  0x59   : > { %s268_s17 = scalar_lea.hbm %s1205_s0, %s705_s9  ;;  %s281_s20 = sshll.u32 %s262_s8, 4  ;;  %s282_s20 = int_to_ptr.vmem [resolvable:$true] %s281_s20 }
  0x5a   : > { %s950_s21 = smov 64   ;;  %s951_s22 = smov 128  }
  0x5b   : > { %288 = sst [smem:[#allocation10]] %s950_s21  ;;  %s952_s11 = smov 1  }
  0x5c   : > { %290 = sst [smem:[#allocation10 + $0x1]] %s951_s22  ;;  %s953_s14 = smov 4  }
  0x5d   : > { %292 = sst [smem:[#allocation10 + $0x2]] %s952_s11  ;;  %s954_s23 = smov [#allocation9]  }
  0x5e   : > { %s680_s30 = sshll.u32 %s273_s18, 26  ;;  %294 = sst [smem:[#allocation10 + $0x3]] %s950_s21 }
  0x5f   : > { %s681_s10 = sadd.s32 134217728, %s680_s30  ;;  %296 = sst [smem:[#allocation10 + $0x4]] %s950_s21 }
  0x60   : > { %298 = sst [smem:[#allocation10 + $0x5]] %s953_s14 }
  0x61   : > { %300 = dma.general %s268_s17, 128, %s282_s20, %s259_s29, %s954_s23, [#allocation10], %s681_s10, 0  }
  0x62 PF: > { %p1229_p2 = scmp.ne.s32.totalorder %s1226_s15, 0 }
  0x63   : > { %s1132_s8 = sand.u32 (!%p1229_p2), 1, %s936_s25   ;;  %p1230_p3 = scmp.ne.s32.totalorder (!%p1229_p2), %s1222_s12, 0 }
  0x64   : > { %306 = sbr.rel (%p1229_p2) target bundleno = 530 (0x212), region = 48  ;;  %s683_s9 = sshll.u32 (!%p1229_p2), %s1132_s8, 4 }
  0x65   : > { %s309_s18 = scalar_lea.sflag (!%p1229_p2), [#allocation3], %s1132_s8  ;;  %s312_s16 = scalar_lea.vmem (!%p1229_p2), [#allocation2], %s683_s9 }
  0x6b   : > { %919 = dma.done.wait (%p1230_p3), %s309_s18, 256  }
  0x6c   : > { %921 = vsyncadd (%p1230_p3), %s309_s18, 4294967040  ;;  %p1231_p6 = scmp.eq.s32.totalorder %s1021_s28, 0 }
  0x6e   : > { %923 = dma.done.wait (%p1231_p6), [#allocation6], 1024   ;;  %p1232_p11 = pmov %p1231_p6 }
  0x6f   : > { %vm354_vm0 = vcmask 523264   ;;  %v352_v0 = vld [vmem:[%s312_s16] sm:$0xff]  ;;  %v353_v1 = vld [vmem:[%s312_s16 + $0x8] sm:$0xff]  ;;  %v955_v10 = vmov 0.0   ;;  %vm956_vm1 = vmmov 0   ;;  %s686_s11 = sshll.u32 %s1132_s8, 3 }
  0x70   : > { %925 = vsyncadd (%p1232_p11), [#allocation6], 4294966272  ;;  %v355_v2 = vsel %vm354_vm0, %v352_v0, 0.0  ;;  %v362_v3 = vmul.f32 %v352_v0, %v352_v0  ;;  %v358_v4 = vsel %vm354_vm0, %v353_v1, 0.0  ;;  %v366_v5 = vmul.f32 %v353_v1, %v353_v1  ;;  %v812_v8 = vld [vmem:[#allocation7] sm:$0xff]   ;;  %716 = vmatprep.subr.bf16.mxu1 %v955_v10  ;;  %728 = vmatprep.subr.bf16.mxu0 %v955_v10  ;;  %v814_v11 = vld [vmem:[#allocation7 + $0x8] sm:$0xff]  }
  0x71   : > { %356 = vadd.xlane.f32.xlu0 %v355_v2  ;;  %v813_v9 = vld [vmem:[#allocation5] sm:$0xff]   ;;  %717 = vmatpush3.bf16.msra.mxu1 %v812_v8  ;;  %v815_v12 = vld [vmem:[#allocation5 + $0x8] sm:$0xff]   ;;  %v816_v13 = vld [vmem:[#allocation7 + $0x10] sm:$0xff]   ;;  %s350_s30 = scalar_lea.vmem [#allocation8], %s686_s11  ;;  %s568_s10 = scalar_lea.sflag [#allocation4], %s1132_s8 }
  0x72   : > { %v363_v6 = vsel %vm354_vm0, %v362_v3, 0.0  ;;  %v367_v7 = vsel %vm354_vm0, %v366_v5, 0.0  ;;  %729 = vmatpush3.bf16.msra.mxu0 %v813_v9  ;;  %718 = vmatprep.subr.bf16.mxu1 %v955_v10  ;;  %v817_v14 = vld [vmem:[#allocation5 + $0x10] sm:$0xff]   ;;  %v818_v15 = vld [vmem:[#allocation7 + $0x18] sm:$0xff]   ;;  %v689_v32 = vld [vmem:[%s1208_s3] ss:$0 sm:$0xff] }
  0x73   : > { %364 = vadd.xlane.f32.xlu1 %v363_v6  ;;  %730 = vmatprep.subr.bf16.mxu0 %v955_v10  ;;  %v819_v16 = vld [vmem:[#allocation5 + $0x18] sm:$0xff]   ;;  %v687_v33 = vld [vmem:[%s1206_s1] ss:$0 sm:$0xff]  ;;  %p1233_p12 = scmp.ne.s32.totalorder %s1223_s13, 0 }
  0x74   : > { %724 = vmatprep.mubr.msk.bf16.mxu1 %vm956_vm1, %v955_v10  ;;  %736 = vmatprep.mubr.msk.bf16.mxu0 %vm956_vm1, %v955_v10  ;;  %v690_v36 = vld [vmem:[%s1209_s4] ss:$0 sm:$0xff] }
  0x75   : > { %359 = vadd.xlane.f32.xlu0 %v358_v4  ;;  %719 = vmatpush3.bf16.msra.mxu1 %v814_v11  ;;  %v688_v37 = vld [vmem:[%s1207_s2] ss:$0 sm:$0xff] }
  0x76   : > { %731 = vmatpush3.bf16.msra.mxu0 %v815_v12  ;;  %720 = vmatprep.subr.bf16.mxu1 %v955_v10 }
  0x77   : > { %368 = vadd.xlane.f32.xlu1 %v367_v7  ;;  %732 = vmatprep.subr.bf16.mxu0 %v955_v10 }
  0x79   : > { %721 = vmatpush3.bf16.msra.mxu1 %v816_v13 }
  0x7a   : > { %733 = vmatpush3.bf16.msra.mxu0 %v817_v14  ;;  %722 = vmatprep.subr.bf16.mxu1 %v955_v10 }
  0x7b   : > { %734 = vmatprep.subr.bf16.mxu0 %v955_v10 }
  0x7d   : > { %723 = vmatpush3.bf16.msra.mxu1 %v818_v15 }
  0x7e   : > { %735 = vmatpush3.bf16.msra.mxu0 %v819_v16 }
  0xfe   : > { %v357_v17 = vpop.xlane.xlu0 %356 }
 0x100   : > { %v365_v18 = vpop.xlane.xlu1 %364 }
 0x102   : > { %v360_v19 = vpop.xlane.xlu0 %359 }
 0x103   : > { %v361_v20 = vadd.f32 %v360_v19, %v357_v17 }
 0x104   : > { %v369_v21 = vpop.xlane.xlu1 %368 }
 0x105   : > { %v371_v22 = vmul.f32 0.0078125, %v361_v20  ;;  %v370_v23 = vadd.f32 %v369_v21, %v365_v18 }
 0x107   : > { %v372_v24 = vmul.f32 0.0078125, %v370_v23  ;;  %v373_v25 = vmul.f32 %v371_v22, %v371_v22  ;;  %v378_v29 = vsub.f32 %v352_v0, %v371_v22  ;;  %v396_v30 = vsub.f32 %v353_v1, %v371_v22 }
 0x109   : > { %v374_v26 = vsub.f32 %v372_v24, %v373_v25 }
 0x10b   : > { %v375_v27 = vmax.f32 %v374_v26, 0.0 }
 0x10d   : > { %v376_v28 = vadd.f32 1e-05, %v375_v27 }
 0x10f   : > { %820 = vrsqrt.f32 %v376_v28 }
 0x119   : > { %v821_v31 = vpop.eup %820 }
 0x11a   : > { %v397_v34 = vmul.f32 %v821_v31, %v396_v30  ;;  %v379_v35 = vmul.f32 %v821_v31, %v378_v29 }
 0x11c   : > { %v405_v38 = vmul.f32 %v689_v32, %v397_v34  ;;  %v387_v39 = vmul.f32 %v687_v33, %v379_v35 }
 0x11e   : > { %v413_v40 = vadd.f32 %v690_v36, %v405_v38  ;;  %v395_v41 = vadd.f32 %v688_v37, %v387_v39 }
 0x120   : > { %v423_v42 = vpack.c.bf16 %v413_v40, %v413_v40  ;;  %v414_v43 = vpack.c.bf16 %v395_v41, %v395_v41 }
 0x122   : > { %725 = vmatmul.mubr.msk.bf16.vlgmr.msra.gmra.mrb[0].mxu1 %vm354_vm0, %v423_v42  ;;  %737 = vmatmul.mubr.msk.bf16.vlgmr.msra.gmra.mrb[0].mxu0 %vm354_vm0, %v414_v43 }
 0x1f2   : > { %574 = sbr.rel (!%p1233_p12) target bundleno = 530 (0x212), region = 64 }
 0x1f5   : > { %v493_v44 = vpop.f32.mrb[0].mxu1  ;;  %v560_v45 = vpop.f32.mrb[0].mxu0 }
 0x1f6   : > { %v561_v46 = vadd.f32 %v560_v45, %v493_v44  ;;  %v726_v47 = vpop.f32.mrb[1].mxu1  ;;  %v738_v48 = vpop.f32.mrb[1].mxu0 }
 0x1f7   : > { %v496_v49 = vpop.f32.mrb[2].mxu1  ;;  %v563_v50 = vpop.f32.mrb[2].mxu0 }
 0x1f8   : > { %566 = vst.msk [vmem:[%s350_s30] sm:$0xff] %vm354_vm0, %v561_v46  ;;  %v727_v51 = vpop.f32.mrb[3].mxu1  ;;  %v739_v52 = vpop.f32.mrb[3].mxu0 }
 0x1f9   : > { %577 = vsyncadd %s568_s10, 64  ;;  %s702_s14 = sshll.u32 %s1021_s28, 6  ;;  %s580_s23 = sshll.u32 %s350_s30, 4  ;;  %s581_s23 = int_to_ptr.vmem [resolvable:$true] %s580_s23 }
 0x1fa   : > { %s1173_s16 = scalar_lea.hbm %s1212_s7, %s702_s14  ;;  %s878_s12 = scalar_lea.vmem %s581_s23, 64 }
 0x1fb   : > { %p879_p13 = scmp.ne.s32.totalorder %s581_s23, %s878_s12  ;;  %s957_s15 = smov [#allocation8]  }
 0x1fc   : > { %s880_s29 = sshll.u32 %s957_s15, 4  ;;  %s881_s29 = int_to_ptr.vmem [resolvable:$false] %s880_s29 }
 0x1fd   : > { %s882_s19 = scalar_lea.vmem %s881_s29, 256  ;;  %p883_p0 = scmp.lt.s32.totalorder %s581_s23, %s881_s29 }
 0x1fe   : > { %p884_p7 = scmp.lt.s32.totalorder %s882_s19, %s878_s12 }
 0x200   : > { %p885_p8 = por %p884_p7, %p883_p0 }
 0x202   : > { %p886_p9 = pnand %p885_p8, %p879_p13 }
 0x204   : > { %889 = shalt.err (!%p886_p9)
}
 0x205   : > { %s890_s28 = scalar_lea.hbm %s1173_s16, 64  ;;  %s892_s20 = scalar_lea.hbm %s1212_s7, 512 }
 0x206   : > { %p891_p10 = scmp.ne.s32.totalorder %s1173_s16, %s890_s28  ;;  %p893_p1 = scmp.lt.u32.totalorder %s1173_s16, %s1212_s7 }
 0x207   : > { %p894_p4 = scmp.lt.u32.totalorder %s892_s20, %s890_s28  ;;  %p896_p2 = scmp.lt.u32.totalorder %s890_s28, %s1173_s16 }
 0x209   : > { %p895_p5 = por %p894_p4, %p893_p1 }
 0x20b   : > { %p897_p3 = por %p896_p2, %p895_p5 }
 0x20d   : > { %p898_p6 = pnand %p897_p3, %p891_p10 }
 0x20f   : > { %901 = shalt.err (!%p898_p6)
}
 0x210   : > { %s958_s11 = smov 64   ;;  %s959_s30 = smov 4  }
 0x211   : > { %586 = dma.vmem_to_hbm [thread:$0]  %s581_s23, 64, %s1173_s16, %s568_s10, %s958_s11, %s958_s11, %s959_s30  }
 0x212 PF: > { %s1234_s14 = sld [smem:[#allocation16_spill]]  ;;  %p766_p11 = scmp.ge.s32.totalorder %s944_s27, 2 }
 0x213   : > { %s595_s9 = sand.u32 1, %s932_s24  }
 0x214   : > { %s596_s18 = scalar_lea.sflag [#allocation4], %s595_s9 }
 0x218   : > { %p1235_p12 = scmp.ne.s32.totalorder %s1234_s14, 0 }
 0x21a   : > { %p759_p13 = pnand %p766_p11, %p1235_p12 }
 0x21c   : > { %927 = dma.done.wait (!%p759_p13), %s596_s18, 128  }
 0x21d   : > { %929 = vsyncadd (!%p759_p13), %s596_s18, 4294967168  ;;  %s1236_s27 = sld [smem:[#allocation14_spill]]  ;;  %s1237_s12 = sld [smem:[#allocation15_spill]] }
 0x21e   : > { %s1238_s24 = smov %s936_s25  ;;  %s1239_s25 = smov %s940_s26 }
 0x223   : > { %p21_p0 = scmp.ge.s32.totalorder %s1236_s27, 10   ;;  %s1240_s26 = smov %s1237_s12 }
 0x225   :  { %23 = sbr.rel (!%p21_p0) target bundleno = 6 (0x6), region = 106 }
 0x22c   :  { %601 = vsyncpa [#allocation3], 1 }
 0x22d   :  { %603 = vsyncpa [#allocation3 + $0x1], 1 }
 0x22e   :  { %604 = vsyncpa [#allocation6], 1 }
 0x22f   :  { %605 = vsyncpa [#allocation4], 1 }
 0x230   :  { %607 = vsyncpa [#allocation4 + $0x1], 1 }

// kernel: tpu_custom_call.1
= control target key start
LH: loop header
LB: loop body
LE: loop exit
PB: predicated region body
PF: predicated region fallthrough
CT: control target
= control target key end

     0   :  { %12 = vsyncpa [#allocation3], 0  ;;  %s1250_s0 = inlined_call_operand.hbm [shape: f32[8,2,4,64], index: 0, kind: input, shape index: {}]   ;;  %s1251_s1 = inlined_call_operand.vmem [shape: f32[1,64], index: 1, kind: input, shape index: {}]   ;;  %s1252_s2 = inlined_call_operand.vmem [shape: f32[1,64], index: 2, kind: input, shape index: {}]   ;;  %s1253_s3 = inlined_call_operand.vmem [shape: f32[1,64], index: 3, kind: input, shape index: {}]   ;;  %s1254_s4 = inlined_call_operand.vmem [shape: f32[1,64], index: 4, kind: input, shape index: {}]   ;;  %s1255_s5 = inlined_call_operand.hbm [shape: bf16[64,64], index: 5, kind: input, shape index: {}]   ;;  %s1256_s6 = inlined_call_operand.hbm [shape: bf16[64,64], index: 6, kind: input, shape index: {}]   ;;  %s1257_s7 = inlined_call_operand.hbm [shape: f32[8,4,64], index: 7, kind: output, shape index: {}]  }
   0x1   :  { %14 = vsyncpa [#allocation3 + $0x1], 0 }
   0x2   :  { %15 = vsyncpa [#allocation6], 0 }
   0x3   :  { %16 = vsyncpa [#allocation4], 0 }
   0x4   :  { %18 = vsyncpa [#allocation4 + $0x1], 0  ;;  %s1000_s24 = smov 0   ;;  %s1002_s25 = smov 0  }
   0x5   :  { %s1004_s26 = smov 0   ;;  %s1006_s27 = smov 0  }
   0x6 LB: > { %s1021_s28 = sadd.s32 4294967295, %s950_s27   ;;  %s646_s29 = sadd.s32 4294967294, %s950_s27   ;;  %s950_s27 = sphi %s1006_s27, %s1278_s27   ;;  %s946_s26 = sphi %s1004_s26, %s1277_s26   ;;  %s942_s25 = sphi %s1002_s25, %s1276_s25   ;;  %s938_s24 = sphi %s1000_s24, %s1275_s24  }
   0x7   : > { %p44_p0 = scmp.ne.s32.totalorder %s942_s25, %s938_s24  ;;  %p1258_p1 = scmp.eq.s32.totalorder %s1021_s28, 0 }
   0x8   : > { %p200_p3 = scmp.eq.s32.totalorder %s646_s29, 7  ;;  %p647_p5 = scmp.ge.s32.totalorder %s950_s27, 1 }
   0x9   : > { %p1030_p4 = por %p1258_p1, %p44_p0  ;;  %p207_p7 = scmp.lt.s32.totalorder %s950_s27, 9 }
   0xa   : > { %p1035_p6 = por %p200_p3, %p44_p0  ;;  %s952_s10 = smov [#allocation5]  }
   0xb   : > { %s1262_s30 = scalar_select %p1030_p4, 1, 0 }
   0xc   : > { %s1263_s8 = scalar_select %p1035_p6, 1, 0 }
   0xd   : > { %p1040_p8 = pnand %p647_p5, %p207_p7  ;;  %s231_s11 = sshll.u32 %s952_s10, 4  ;;  %s232_s11 = int_to_ptr.vmem [resolvable:$true] %s231_s11 }
   0xe   : > { %s953_s13 = smov [#allocation7]   ;;  %s794_s17 = scalar_lea.hbm %s1255_s5, 512 }
   0xf   : > { %s1264_s9 = scalar_select %p1040_p8, 1, 0 }
  0x10   : > { %p725_p9 = pneg %p1040_p8  ;;  %s244_s14 = sshll.u32 %s953_s13, 4  ;;  %s1052_s14 = int_to_ptr.vmem [resolvable:$true] %s244_s14 }
  0x11   : > { %p795_p11 = scmp.ne.s32.totalorder %s1255_s5, %s794_s17  ;;  %p801_p3 = scmp.lt.u32.totalorder %s794_s17, %s1255_s5 }
  0x12   : > { %p1048_p10 = pnand %p725_p9, %p1258_p1 }
  0x14   : > { %p796_p12 = pneg %p1048_p10 }
  0x16   : > { %p797_p13 = pnand %p796_p12, %p795_p11 }
  0x18   : > { %p798_p0 = pneg %p797_p13 }
  0x1a   : > { %p803_p5 = pnand %p801_p3, %p798_p0 }
  0x1c   : > { %806 = shalt.err (!%p803_p5)
}
  0x1d   : > { %s807_s22 = scalar_lea.vmem %s232_s11, 512  ;;  %p815_p2 = scmp.lt.s32.totalorder %s232_s11, %s232_s11 }
  0x1e   : > { %p808_p7 = scmp.ne.s32.totalorder %s232_s11, %s807_s22  ;;  %p816_p6 = scmp.lt.s32.totalorder %s807_s22, %s807_s22 }
  0x20   : > { %p810_p9 = pnand %p808_p7, %p796_p12  ;;  %p817_p4 = por %p816_p6, %p815_p2 }
  0x22   : > { %p811_p1 = pneg %p810_p9 }
  0x24   : > { %p818_p8 = pnand %p817_p4, %p811_p1 }
  0x26   : > { %821 = shalt.err (!%p818_p8)
}
  0x27   : > { %s1261_s23 = smov 64   ;;  %s955_s29 = smov 4  }
  0x28   : > { %728 = dma.hbm_to_vmem [thread:$0]  (!%p1048_p10), %s1255_s5, 512, %s232_s11, [#allocation6], %s1261_s23, %s1261_s23, %s955_s29  }
  0x29   : > { %s822_s17 = scalar_lea.hbm %s1256_s6, 512 }
  0x2a   : > { %p823_p1 = scmp.ne.s32.totalorder %s1256_s6, %s822_s17  ;;  %p829_p6 = scmp.lt.u32.totalorder %s822_s17, %s1256_s6 }
  0x2c   : > { %p825_p2 = pnand %p823_p1, %p796_p12 }
  0x2e   : > { %p826_p4 = pneg %p825_p2 }
  0x30   : > { %p831_p8 = pnand %p829_p6, %p826_p4 }
  0x32   : > { %834 = shalt.err (!%p831_p8)
}
  0x33   : > { %s835_s11 = scalar_lea.vmem %s1052_s14, 512  ;;  %p843_p3 = scmp.lt.s32.totalorder %s1052_s14, %s1052_s14 }
  0x34   : > { %p836_p11 = scmp.ne.s32.totalorder %s1052_s14, %s835_s11  ;;  %p844_p5 = scmp.lt.s32.totalorder %s835_s11, %s835_s11 }
  0x36   : > { %p838_p13 = pnand %p836_p11, %p796_p12  ;;  %p845_p7 = por %p844_p5, %p843_p3 }
  0x38   : > { %p839_p0 = pneg %p838_p13 }
  0x3a   : > { %p846_p9 = pnand %p845_p7, %p839_p0 }
  0x3c   : > { %849 = shalt.err (!%p846_p9)
}
  0x3d   : > { %731 = dma.hbm_to_vmem [thread:$0]  (!%p1048_p10), %s1256_s6, 512, %s1052_s14, [#allocation6], %s1261_s23, %s1261_s23, %s955_s29  }
  0x3e   : > { %s1108_s12 = sadd.s32 1, %s950_s27   ;;  %s31_s13 = sadd.s32 1, %s946_s26 }
  0x3f   : > { %s28_s15 = ssub.s32 %s950_s27, %s1108_s12  ;;  %p38_p12 = scmp.ne.s32.totalorder %s946_s26, %s942_s25 }
  0x40   : > { %p29_p1 = scmp.eq.s32.totalorder %s28_s15, 0  ;;  %p39_p2 = scmp.eq.s32.totalorder %s950_s27, 0 }
  0x41   : > { %p1266_p4 = scmp.eq.s32.totalorder %s1021_s28, 7  ;;  %p742_p8 = scmp.lt.s32.totalorder %s950_s27, 8 }
  0x42   : > { %s1124_s17 = scalar_select %p29_p1, %s946_s26, %s31_s13  }
  0x43   : > { %p1118_p6 = por %p1266_p4, %p38_p12  ;;  %p40_p11 = por %p39_p2, %p38_p12 }
  0x44   : > { %s258_s18 = sand.u32 1, %s946_s26   ;;  %s677_s14 = sshll.u32 %s950_s27, 7 }
  0x45   : > { %s651_s19 = sshll.u32 %s258_s18, 3  ;;  %s1131_s11 = scalar_lea.hbm %s1250_s0, %s677_s14 }
  0x46   : > { %s262_s22 = scalar_lea.vmem [#allocation2], %s651_s19  ;;  %p1135_p10 = pnand %p742_p8, %p40_p11 }
  0x47   : > { %s269_s10 = sshll.u32 %s262_s22, 4  ;;  %s1139_s15 = scalar_lea.sflag [#allocation3], %s258_s18  ;;  %s1133_s10 = int_to_ptr.vmem [resolvable:$true] %s269_s10 }
  0x48   : > { %s850_s23 = scalar_lea.hbm %s1131_s11, 128  ;;  %p852_p0 = pneg %p1135_p10 }
  0x49   : > { %p851_p13 = scmp.ne.s32.totalorder %s1131_s11, %s850_s23  ;;  %s855_s20 = scalar_lea.hbm %s1250_s0, 1024 }
  0x4a   : > { %p856_p7 = scmp.lt.u32.totalorder %s1131_s11, %s1250_s0  ;;  %p857_p9 = scmp.lt.u32.totalorder %s855_s20, %s850_s23 }
  0x4b   : > { %p853_p3 = pnand %p852_p0, %p851_p13  ;;  %p859_p1 = scmp.lt.u32.totalorder %s850_s23, %s1131_s11 }
  0x4c   : > { %p858_p12 = por %p857_p9, %p856_p7 }
  0x4d   : > { %p854_p5 = pneg %p853_p3 }
  0x4e   : > { %p860_p2 = por %p859_p1, %p858_p12 }
  0x50   : > { %p861_p4 = pnand %p860_p2, %p854_p5 }
  0x52   : > { %864 = shalt.err (!%p861_p4)
}
  0x53   : > { %s865_s18 = scalar_lea.vmem %s1133_s10, 128  ;;  %s956_s19 = smov [#allocation2]  }
  0x54   : > { %p866_p8 = scmp.ne.s32.totalorder %s1133_s10, %s865_s18  ;;  %s870_s14 = sshll.u32 %s956_s19, 4  ;;  %s871_s14 = int_to_ptr.vmem [resolvable:$false] %s870_s14 }
  0x55   : > { %s872_s21 = scalar_lea.vmem %s871_s14, 256  ;;  %p873_p3 = scmp.lt.s32.totalorder %s1133_s10, %s871_s14 }
  0x56   : > { %p868_p11 = pnand %p866_p8, %p852_p0  ;;  %p874_p7 = scmp.lt.s32.totalorder %s872_s21, %s865_s18 }
  0x58   : > { %p869_p13 = pneg %p868_p11  ;;  %p875_p9 = por %p874_p7, %p873_p3 }
  0x5a   : > { %p876_p12 = pnand %p875_p9, %p869_p13 }
  0x5c   : > { %879 = shalt.err (!%p876_p12)
}
  0x5d   : > { %s1269_s23 = smov 64   ;;  %p1270_p0 = scmp.ne.s32.totalorder %s1264_s9, 0 }
  0x5e   : > { %735 = dma.hbm_to_vmem [thread:$0]  (!%p1135_p10), %s1131_s11, 128, %s1133_s10, %s1139_s15, %s1269_s23, %s1269_s23, %s955_s29  }
  0x5f   : > { %281 = sbr.rel (%p1270_p0) target bundleno = 513 (0x201), region = 48  ;;  %s1173_s20 = sand.u32 (!%p1270_p0), 1, %s942_s25  }
  0x60   : > { %s655_s22 = sshll.u32 (!%p1270_p0), %s1173_s20, 3  ;;  %s284_s18 = scalar_lea.sflag (!%p1270_p0), [#allocation3], %s1173_s20 }
  0x61   : > { %s287_s19 = scalar_lea.vmem (!%p1270_p0), [#allocation2], %s655_s22  ;;  %p1271_p5 = scmp.ne.s32.totalorder (!%p1270_p0), %s1262_s30, 0 }
  0x66   : > { %925 = dma.done.wait (%p1271_p5), %s284_s18, 128  }
  0x67   : > { %927 = vsyncadd (%p1271_p5), %s284_s18, 4294967168  ;;  %p1272_p1 = scmp.eq.s32.totalorder %s1021_s28, 0 }
  0x69   : > { %929 = dma.done.wait (%p1272_p1), [#allocation6], 1024   ;;  %p1273_p10 = pmov %p1272_p1 }
  0x6a   : > { %vm329_vm0 = vcmask 519168   ;;  %v327_v0 = vld [vmem:[%s287_s19] sm:$0xf]  ;;  %v328_v1 = vld [vmem:[%s287_s19 + $0x4] sm:$0xf]  ;;  %v784_v8 = vld [vmem:[#allocation7] sm:$0xff]  }
  0x6b   : > { %931 = vsyncadd (%p1273_p10), [#allocation6], 4294966272  ;;  %v330_v2 = vsel %vm329_vm0, %v327_v0, 0.0  ;;  %v337_v3 = vmul.f32 %v327_v0, %v327_v0  ;;  %v333_v4 = vsel %vm329_vm0, %v328_v1, 0.0  ;;  %v341_v5 = vmul.f32 %v328_v1, %v328_v1  ;;  %v785_v9 = vld [vmem:[#allocation5] sm:$0xff]   ;;  %v786_v11 = vld [vmem:[#allocation7 + $0x8] sm:$0xff]  }
  0x6c   : > { %331 = vadd.xlane.f32.xlu0 %v330_v2  ;;  %v957_v10 = vmov 0.0   ;;  %v787_v12 = vld [vmem:[#allocation5 + $0x8] sm:$0xff]   ;;  %vm958_vm1 = vmmov 0   ;;  %v788_v13 = vld [vmem:[#allocation7 + $0x10] sm:$0xff]   ;;  %v790_v15 = vld [vmem:[#allocation7 + $0x18] sm:$0xff]   ;;  %vm431_vm2 = vcmask 523264  }
  0x6d   : > { %v338_v6 = vsel %vm329_vm0, %v337_v3, 0.0  ;;  %v342_v7 = vsel %vm329_vm0, %v341_v5, 0.0  ;;  %688 = vmatprep.subr.bf16.mxu1 %v957_v10  ;;  %700 = vmatprep.subr.bf16.mxu0 %v957_v10  ;;  %v789_v14 = vld [vmem:[#allocation5 + $0x10] sm:$0xff]   ;;  %v791_v16 = vld [vmem:[#allocation5 + $0x18] sm:$0xff]   ;;  %s658_s21 = sshll.u32 %s1173_s20, 2  ;;  %s674_s23 = sshll.u32 %s1021_s28, 6 }
  0x6e   : > { %339 = vadd.xlane.f32.xlu1 %v338_v6  ;;  %689 = vmatpush3.bf16.msra.mxu1 %v784_v8  ;;  %v661_v32 = vld [vmem:[%s1253_s3] ss:$0 sm:$0xff]  ;;  %s325_s22 = scalar_lea.vmem [#allocation8], %s658_s21  ;;  %s1206_s9 = scalar_lea.hbm %s1257_s7, %s674_s23 }
  0x6f   : > { %701 = vmatpush3.bf16.msra.mxu0 %v785_v9  ;;  %690 = vmatprep.subr.bf16.mxu1 %v957_v10  ;;  %v659_v33 = vld [vmem:[%s1251_s1] ss:$0 sm:$0xff]  ;;  %s557_s18 = sshll.u32 %s325_s22, 4  ;;  %s544_s28 = scalar_lea.sflag [#allocation4], %s1173_s20  ;;  %s1208_s18 = int_to_ptr.vmem [resolvable:$true] %s557_s18 }
  0x70   : > { %334 = vadd.xlane.f32.xlu0 %v333_v4  ;;  %702 = vmatprep.subr.bf16.mxu0 %v957_v10  ;;  %v662_v36 = vld [vmem:[%s1254_s4] ss:$0 sm:$0xff]  ;;  %s880_s29 = scalar_lea.vmem %s1208_s18, 64  ;;  %s959_s11 = smov [#allocation8]  }
  0x71   : > { %696 = vmatprep.mubr.msk.bf16.mxu1 %vm958_vm1, %v957_v10  ;;  %708 = vmatprep.mubr.msk.bf16.mxu0 %vm958_vm1, %v957_v10  ;;  %v660_v37 = vld [vmem:[%s1252_s2] ss:$0 sm:$0xff]  ;;  %p881_p2 = scmp.ne.s32.totalorder %s1208_s18, %s880_s29  ;;  %s884_s10 = sshll.u32 %s959_s11, 4  ;;  %s885_s10 = int_to_ptr.vmem [resolvable:$false] %s884_s10 }
  0x72   : > { %343 = vadd.xlane.f32.xlu1 %v342_v7  ;;  %691 = vmatpush3.bf16.msra.mxu1 %v786_v11  ;;  %s886_s13 = scalar_lea.vmem %s885_s10, 128  ;;  %p887_p11 = scmp.lt.s32.totalorder %s1208_s18, %s885_s10 }
  0x73   : > { %703 = vmatpush3.bf16.msra.mxu0 %v787_v12  ;;  %692 = vmatprep.subr.bf16.mxu1 %v957_v10  ;;  %p882_p4 = pnand %p881_p2, %p1118_p6  ;;  %p888_p13 = scmp.lt.s32.totalorder %s886_s13, %s880_s29 }
  0x74   : > { %704 = vmatprep.subr.bf16.mxu0 %v957_v10 }
  0x75   : > { %p883_p8 = pneg %p882_p4  ;;  %p889_p3 = por %p888_p13, %p887_p11 }
  0x76   : > { %693 = vmatpush3.bf16.msra.mxu1 %v788_v13 }
  0x77   : > { %705 = vmatpush3.bf16.msra.mxu0 %v789_v14  ;;  %694 = vmatprep.subr.bf16.mxu1 %v957_v10  ;;  %p890_p7 = pnand %p889_p3, %p883_p8 }
  0x78   : > { %706 = vmatprep.subr.bf16.mxu0 %v957_v10 }
  0x7a   : > { %695 = vmatpush3.bf16.msra.mxu1 %v790_v15 }
  0x7b   : > { %707 = vmatpush3.bf16.msra.mxu0 %v791_v16 }
  0xf9   : > { %v332_v17 = vpop.xlane.xlu0 %331 }
  0xfb   : > { %v340_v18 = vpop.xlane.xlu1 %339 }
  0xfd   : > { %v335_v19 = vpop.xlane.xlu0 %334 }
  0xfe   : > { %v336_v20 = vadd.f32 %v335_v19, %v332_v17 }
  0xff   : > { %v344_v21 = vpop.xlane.xlu1 %343 }
 0x100   : > { %v346_v22 = vmul.f32 0.0078125, %v336_v20  ;;  %v345_v23 = vadd.f32 %v344_v21, %v340_v18 }
 0x102   : > { %v347_v24 = vmul.f32 0.0078125, %v345_v23  ;;  %v348_v25 = vmul.f32 %v346_v22, %v346_v22  ;;  %v353_v29 = vsub.f32 %v327_v0, %v346_v22  ;;  %v371_v30 = vsub.f32 %v328_v1, %v346_v22 }
 0x104   : > { %v349_v26 = vsub.f32 %v347_v24, %v348_v25 }
 0x106   : > { %v350_v27 = vmax.f32 %v349_v26, 0.0 }
 0x108   : > { %v351_v28 = vadd.f32 1e-05, %v350_v27 }
 0x10a   : > { %792 = vrsqrt.f32 %v351_v28 }
 0x114   : > { %v793_v31 = vpop.eup %792 }
 0x115   : > { %v372_v34 = vmul.f32 %v793_v31, %v371_v30  ;;  %v354_v35 = vmul.f32 %v793_v31, %v353_v29 }
 0x117   : > { %v380_v38 = vmul.f32 %v661_v32, %v372_v34  ;;  %v362_v39 = vmul.f32 %v659_v33, %v354_v35 }
 0x119   : > { %v388_v40 = vadd.f32 %v662_v36, %v380_v38  ;;  %v370_v41 = vadd.f32 %v660_v37, %v362_v39 }
 0x11b   : > { %v398_v42 = vpack.c.bf16 %v388_v40, %v388_v40  ;;  %v389_v43 = vpack.c.bf16 %v370_v41, %v370_v41 }
 0x11d   : > { %697 = vmatmul.mubr.msk.bf16.vlgmr.msra.gmra.mrb[0].mxu1 %vm431_vm2, %v398_v42  ;;  %709 = vmatmul.mubr.msk.bf16.vlgmr.msra.gmra.mrb[0].mxu0 %vm431_vm2, %v389_v43 }
 0x1f0   : > { %v469_v44 = vpop.f32.mrb[0].mxu1  ;;  %v536_v45 = vpop.f32.mrb[0].mxu0 }
 0x1f1   : > { %v537_v46 = vadd.f32 %v536_v45, %v469_v44  ;;  %v698_v47 = vpop.f32.mrb[1].mxu1  ;;  %v710_v48 = vpop.f32.mrb[1].mxu0 }
 0x1f2   : > { %v472_v49 = vpop.f32.mrb[2].mxu1  ;;  %v539_v50 = vpop.f32.mrb[2].mxu0 }
 0x1f3   : > { %v699_v51 = vpop.f32.mrb[3].mxu1  ;;  %v711_v52 = vpop.f32.mrb[3].mxu0  ;;  %542 = vst.msk [vmem:[%s325_s22] sm:$0xf] %vm329_vm0, %v537_v46 }
 0x1f4   : > { %893 = shalt.err (!%p890_p7)
}
 0x1f5   : > { %s894_s20 = scalar_lea.hbm %s1206_s9, 64  ;;  %s898_s21 = scalar_lea.hbm %s1257_s7, 512 }
 0x1f6   : > { %p895_p9 = scmp.ne.s32.totalorder %s1206_s9, %s894_s20  ;;  %p899_p5 = scmp.lt.u32.totalorder %s1206_s9, %s1257_s7 }
 0x1f7   : > { %p900_p1 = scmp.lt.u32.totalorder %s898_s21, %s894_s20  ;;  %p902_p2 = scmp.lt.u32.totalorder %s894_s20, %s1206_s9 }
 0x1f8   : > { %p896_p12 = pnand %p895_p9, %p1118_p6 }
 0x1f9   : > { %p901_p10 = por %p900_p1, %p899_p5 }
 0x1fa   : > { %p897_p0 = pneg %p896_p12 }
 0x1fb   : > { %p903_p4 = por %p902_p2, %p901_p10 }
 0x1fd   : > { %p904_p8 = pnand %p903_p4, %p897_p0 }
 0x1ff   : > { %907 = shalt.err (!%p904_p8)
}
 0x200   : > { %723 = dma.vmem_to_hbm [thread:$0]  (%p1118_p6), %s1208_s18, 64, %s1206_s9, %s544_s28  }
 0x201 PF: > { %p745_p11 = scmp.ge.s32.totalorder %s950_s27, 2  ;;  %s569_s19 = sand.u32 1, %s938_s24  }
 0x202   : > { %p1274_p13 = scmp.ne.s32.totalorder %s1263_s8, 0  ;;  %s570_s30 = scalar_lea.sflag [#allocation4], %s569_s19 }
 0x204   : > { %p737_p3 = pnand %p745_p11, %p1274_p13 }
 0x206   : > { %933 = dma.done.wait (!%p737_p3), %s570_s30, 64  }
 0x207   : > { %935 = vsyncadd (!%p737_p3), %s570_s30, 4294967232  ;;  %p21_p7 = scmp.ge.s32.totalorder %s1108_s12, 10   ;;  %s1275_s24 = smov %s942_s25 }
 0x208   : > { %s1276_s25 = smov %s946_s26  ;;  %s1277_s26 = smov %s1124_s17 }
 0x209   : > { %s1278_s27 = smov %s1108_s12  ;;  %23 = sbr.rel (!%p21_p7) target bundleno = 6 (0x6), region = 101 }
 0x210   :  { %575 = vsyncpa [#allocation3], 1 }
 0x211   :  { %577 = vsyncpa [#allocation3 + $0x1], 1 }
 0x212   :  { %578 = vsyncpa [#allocation6], 1 }
 0x213   :  { %579 = vsyncpa [#allocation4], 1 }
 0x214   :  { %581 = vsyncpa [#allocation4 + $0x1], 1 }

</bundles_post_ra>
